<compile_context>
chip_gen: v7x
topology: tpu7x:2x2x1
jax: 0.10.0
libtpu: 0.0.40
codegen_flags: <defaults>
</compile_context>

<pallas_src>
import math
from functools import partial

import jax
import jax.numpy as jnp
from jax import lax
from jax.experimental import pallas as pl
from jax.experimental.pallas import tpu as pltpu

LN_EPS = 1e-5       # PyTorch nn.LayerNorm default
LANE = 128
SUBLANE = 8
NEG_INF = -1e30     # large finite negative (avoids inf-inf -> NaN on padded rows)


def _round_up(n, m):
    return ((n + m - 1) // m) * m


def _pad_axis(a, width, axis=-1):
    pad = width - a.shape[axis]
    if pad <= 0:
        return a
    cfg = [(0, 0)] * a.ndim
    cfg[axis] = (0, pad)
    return jnp.pad(a, cfg)


def _layernorm(x, g, b):
    mu = jnp.mean(x, axis=-1, keepdims=True)
    var = jnp.mean(jnp.square(x - mu), axis=-1, keepdims=True)
    return (x - mu) * lax.rsqrt(var + LN_EPS) * g + b


# --------------------------------------------------------------------------
# Kernel 1: fused 2-layer encoders (state / key / action), Linear->ReLU->Linear.
#   grid = (encoder, row_tile); weights stacked [3, ...]; lane-padded I/O.
# --------------------------------------------------------------------------
def _enc_kernel(x_ref, w1_ref, b1_ref, w2_ref, b2_ref, o_ref):
    x = x_ref[0].astype(jnp.bfloat16)
    h = jnp.dot(x, w1_ref[0], preferred_element_type=jnp.float32) + b1_ref[0]
    h = jnp.maximum(h, 0.0).astype(jnp.bfloat16)
    o_ref[0] = jnp.dot(h, w2_ref[0], preferred_element_type=jnp.float32) + b2_ref[0]


def fused_encoders(x_stack, w1, b1, w2, b2, *, max_tile_m=256):
    E, n, din = x_stack.shape
    hid = w1.shape[2]
    dout = w2.shape[2]

    tm = min(max_tile_m, _round_up(n, SUBLANE))
    n_pad = _round_up(n, tm)
    if n_pad != n:
        x_stack = jnp.pad(x_stack, ((0, 0), (0, n_pad - n), (0, 0)))

    out = pl.pallas_call(
        _enc_kernel,
        out_shape=jax.ShapeDtypeStruct((E, n_pad, dout), jnp.float32),
        grid=(E, n_pad // tm),
        in_specs=[pl.BlockSpec((1, tm, din), lambda e, i: (e, i, 0)),
                  pl.BlockSpec((1, din, hid), lambda e, i: (e, 0, 0)),
                  pl.BlockSpec((1, 1, hid), lambda e, i: (e, 0, 0)),
                  pl.BlockSpec((1, hid, dout), lambda e, i: (e, 0, 0)),
                  pl.BlockSpec((1, 1, dout), lambda e, i: (e, 0, 0))],
        out_specs=pl.BlockSpec((1, tm, dout), lambda e, i: (e, i, 0)),
        compiler_params=pltpu.CompilerParams(
            dimension_semantics=("parallel", "parallel")),
    )(x_stack, w1, b1, w2, b2)
    return out[:, :n, :]


# --------------------------------------------------------------------------
# Kernel 2: fused LayerNorm + 3-layer MLP predictors (action / state).
#   grid = (predictor, row_tile); weights stacked [P, ...]; LayerNorm over the
#   true (unpadded) model dim C; lane-padded outputs.
# --------------------------------------------------------------------------
def _pred_kernel(x_ref, g_ref, bln_ref, w1_ref, b1_ref, w2_ref, b2_ref,
                 w3_ref, b3_ref, o_ref):
    x = _layernorm(x_ref[0], g_ref[0], bln_ref[0]).astype(jnp.bfloat16)
    h = jnp.maximum(
        jnp.dot(x, w1_ref[0], preferred_element_type=jnp.float32) + b1_ref[0], 0.0
    ).astype(jnp.bfloat16)
    h = jnp.maximum(
        jnp.dot(h, w2_ref[0], preferred_element_type=jnp.float32) + b2_ref[0], 0.0
    ).astype(jnp.bfloat16)
    o_ref[0] = jnp.dot(h, w3_ref[0], preferred_element_type=jnp.float32) + b3_ref[0]


def fused_predictors(x_stack, g, bln, w1, b1, w2, b2, w3, b3, *, max_tile_m=256):
    P, n, c = x_stack.shape
    h1 = w1.shape[2]
    h2 = w2.shape[2]
    dout = w3.shape[2]

    tm = min(max_tile_m, _round_up(n, SUBLANE))
    n_pad = _round_up(n, tm)
    if n_pad != n:
        x_stack = jnp.pad(x_stack, ((0, 0), (0, n_pad - n), (0, 0)))

    pmap = lambda p, i: (p, 0, 0)
    out = pl.pallas_call(
        _pred_kernel,
        out_shape=jax.ShapeDtypeStruct((P, n_pad, dout), jnp.float32),
        grid=(P, n_pad // tm),
        in_specs=[pl.BlockSpec((1, tm, c), lambda p, i: (p, i, 0)),
                  pl.BlockSpec((1, 1, c), pmap),
                  pl.BlockSpec((1, 1, c), pmap),
                  pl.BlockSpec((1, c, h1), pmap),
                  pl.BlockSpec((1, 1, h1), pmap),
                  pl.BlockSpec((1, h1, h2), pmap),
                  pl.BlockSpec((1, 1, h2), pmap),
                  pl.BlockSpec((1, h2, dout), pmap),
                  pl.BlockSpec((1, 1, dout), pmap)],
        out_specs=pl.BlockSpec((1, tm, dout), lambda p, i: (p, i, 0)),
        compiler_params=pltpu.CompilerParams(
            dimension_semantics=("parallel", "parallel")),
    )(x_stack, g, bln, w1, b1, w2, b2, w3, b3)
    return out[:, :n, :]


# --------------------------------------------------------------------------
# Kernel 3: fused stack of transformer Blocks.
#   grid = (batch, layer); activations kept resident in VMEM scratch across
#   the whole layer loop; per-layer weights stacked [L, ...] and streamed.
#   Outputs: x after the last layer, and x after `state_layer` (mid feature).
# --------------------------------------------------------------------------
def _blocks_kernel(x_ref, ln1g, ln1b, wq, bq, wk, bk, wv, bv, wo, bo,
                   ln2g, ln2b, wfc, bfc, wpr, bpr,
                   xf_ref, xm_ref, x_acc, y_acc, mask_scr, *, n_head, state_layer):
    l = pl.program_id(1)
    n_layer = pl.num_programs(1)
    _, S, C = x_ref.shape
    D = C // n_head
    scale = 1.0 / math.sqrt(D)

    @pl.when(l == 0)
    def _():
        x_acc[...] = x_ref[0]          # bring the batch element into residence
        # additive causal mask, built once per batch element, reused by every
        # layer and head for the rest of the layer loop
        row = lax.broadcasted_iota(jnp.int32, (S, S), 0)
        col = lax.broadcasted_iota(jnp.int32, (S, S), 1)
        mask_scr[...] = jnp.where(row >= col, 0.0, NEG_INF).astype(jnp.float32)

    x = x_acc[...]                     # (S, C) float32, resident across layers

    # ---- attention branch (pre-LN) ----
    xn = _layernorm(x, ln1g[0], ln1b[0]).astype(jnp.bfloat16)
    q = ((jnp.dot(xn, wq[0], preferred_element_type=jnp.float32) + bq[0]) * scale
         ).astype(jnp.bfloat16)                                  # scale folded once
    k = (jnp.dot(xn, wk[0], preferred_element_type=jnp.float32) + bk[0]
         ).astype(jnp.bfloat16)
    v = (jnp.dot(xn, wv[0], preferred_element_type=jnp.float32) + bv[0]
         ).astype(jnp.bfloat16)

    mask_bias = mask_scr[...]

    for h in range(n_head):            # static unrolled loop over heads
        lo, hi = h * D, (h + 1) * D
        att = lax.dot_general(q[:, lo:hi], k[:, lo:hi],
                              (((1,), (1,)), ((), ())),          # q @ k^T, no transpose
                              preferred_element_type=jnp.float32)
        att = att + mask_bias
        m = jnp.max(att, axis=-1, keepdims=True)
        p = jnp.exp(att - m)
        inv = pl.reciprocal(jnp.sum(p, axis=-1, keepdims=True), approx=True)
        p = (p * inv).astype(jnp.bfloat16)
        # write this head's output directly into its slab slice (no concat)
        y_acc[:, lo:hi] = jnp.dot(p, v[:, lo:hi],
                                  preferred_element_type=jnp.float32)

    y = jnp.dot(y_acc[...].astype(jnp.bfloat16), wo[0],
                preferred_element_type=jnp.float32) + bo[0]
    x = x + y

    # ---- MLP branch (pre-LN) ----
    xn2 = _layernorm(x, ln2g[0], ln2b[0]).astype(jnp.bfloat16)
    h1 = jnp.dot(xn2, wfc[0], preferred_element_type=jnp.float32) + bfc[0]
    h1 = jax.nn.gelu(h1, approximate=True).astype(jnp.bfloat16)
    h2 = jnp.dot(h1, wpr[0], preferred_element_type=jnp.float32) + bpr[0]
    x = x + h2

    x_acc[...] = x

    @pl.when(l == state_layer)
    def _():
        xm_ref[0] = x                  # mid feature for the state predictor

    @pl.when(l == n_layer - 1)
    def _():
        xf_ref[0] = x                  # final feature


_BLOCK_PARAM_ORDER = ("ln1_g", "ln1_b", "wq", "bq", "wk", "bk", "wv", "bv",
                      "wo", "bo", "ln2_g", "ln2_b", "wfc", "bfc", "wpr", "bpr")


def transformer_blocks(x, bp, n_head, state_layer):
    B, S, C = x.shape
    L = bp["wq"].shape[0]

    x_map = lambda b, l: (b, 0, 0)
    p_map = lambda b, l: (l, 0, 0)

    in_specs = [pl.BlockSpec((1, S, C), x_map)]
    args = [x]
    for name in _BLOCK_PARAM_ORDER:
        a = bp[name]
        in_specs.append(pl.BlockSpec((1,) + a.shape[1:], p_map))
        args.append(a)

    # NOTE(v7x): for large C, add pltpu.CompilerParams(vmem_limit_bytes=...) and
    # k-tile wfc/wpr over an extra "arbitrary" grid axis to fit 64 MiB VMEM.
    x_final, x_mid = pl.pallas_call(
        partial(_blocks_kernel, n_head=n_head, state_layer=state_layer),
        out_shape=(jax.ShapeDtypeStruct((B, S, C), jnp.float32),
                   jax.ShapeDtypeStruct((B, S, C), jnp.float32)),
        grid=(B, L),
        in_specs=in_specs,
        out_specs=(pl.BlockSpec((1, S, C), x_map),
                   pl.BlockSpec((1, S, C), x_map)),
        scratch_shapes=[pltpu.VMEM((S, C), jnp.float32),   # resident activations
                        pltpu.VMEM((S, C), jnp.float32),   # per-head output slab
                        pltpu.VMEM((S, S), jnp.float32)],  # cached causal-mask bias
        compiler_params=pltpu.CompilerParams(
            dimension_semantics=("parallel", "arbitrary")),
    )(*args)
    return x_final, x_mid


# --------------------------------------------------------------------------
# Parameter init (mirrors _init_weights: N(0, 0.02) weights, zero biases,
# LayerNorm weight=1 bias=0, pos-emb parameters stay zero).  Weights are
# stored [in, out], padded to lane-friendly widths, cast to bf16 for the MXU;
# LayerNorm params / biases stay f32.  Encoder weights are stacked over the
# 3 encoders, predictor weights over the 2 predictors, block weights over L.
# --------------------------------------------------------------------------
def init_params(key, cfg, state_dim, action_dim, key_dim):
    C = cfg["n_embd"]
    L = cfg["n_layer"]
    C_pad = _round_up(C, LANE)
    in_pad = _round_up(max(state_dim, action_dim, key_dim), LANE)
    out_pad = _round_up(max(state_dim, action_dim), LANE)
    ENC_HID = 256
    PRED_HID = 256

    keys = iter(jax.random.split(key, 64))

    def w(shape):
        return 0.02 * jax.random.normal(next(keys), shape, jnp.float32)

    def wbf(shape):
        return w(shape).astype(jnp.bfloat16)

    zeros = lambda s: jnp.zeros(s, jnp.float32)
    ones = lambda s: jnp.ones(s, jnp.float32)

    # encoders, order [state, key, action]; MLP(in_d, C, hidden_dims=[256])
    enc_w1 = jnp.stack([_pad_axis(w((state_dim, ENC_HID)), in_pad, axis=0),
                        _pad_axis(w((key_dim, ENC_HID)), in_pad, axis=0),
                        _pad_axis(w((action_dim, ENC_HID)), in_pad, axis=0)]
                       ).astype(jnp.bfloat16)
    enc_w2 = jnp.stack([_pad_axis(w((ENC_HID, C)), C_pad, axis=1) for _ in range(3)]
                       ).astype(jnp.bfloat16)

    # predictors, order [action, state]; MLP(C, out_d, hidden_dims=[256, 256])
    pred_w1 = jnp.stack([w((C, PRED_HID)), w((C, PRED_HID))]).astype(jnp.bfloat16)
    pred_w2 = jnp.stack([w((PRED_HID, PRED_HID)),
                         w((PRED_HID, PRED_HID))]).astype(jnp.bfloat16)
    pred_w3 = jnp.stack([_pad_axis(w((PRED_HID, action_dim)), out_pad, axis=1),
                         _pad_axis(w((PRED_HID, state_dim)), out_pad, axis=1)]
                        ).astype(jnp.bfloat16)

    blocks = dict(
        ln1_g=ones((L, 1, C)), ln1_b=zeros((L, 1, C)),
        wq=wbf((L, C, C)), bq=zeros((L, 1, C)),
        wk=wbf((L, C, C)), bk=zeros((L, 1, C)),
        wv=wbf((L, C, C)), bv=zeros((L, 1, C)),
        wo=wbf((L, C, C)), bo=zeros((L, 1, C)),
        ln2_g=ones((L, 1, C)), ln2_b=zeros((L, 1, C)),
        wfc=wbf((L, C, 4 * C)), bfc=zeros((L, 1, 4 * C)),
        wpr=wbf((L, 4 * C, C)), bpr=zeros((L, 1, C)),
    )

    return dict(
        state_dim=state_dim, action_dim=action_dim, key_dim=key_dim,
        local_pos_emb=zeros((1, cfg["block_size"], C)),
        global_pos_emb=zeros((1, cfg["max_timestep"], C)),
        enc_w1=enc_w1, enc_b1=zeros((3, 1, ENC_HID)),
        enc_w2=enc_w2, enc_b2=zeros((3, 1, C_pad)),
        blocks=blocks,
        pred_ln_g=ones((2, 1, C)), pred_ln_b=zeros((2, 1, C)),   # [action, state]
        pred_w1=pred_w1, pred_b1=zeros((2, 1, PRED_HID)),
        pred_w2=pred_w2, pred_b2=zeros((2, 1, PRED_HID)),
        pred_w3=pred_w3, pred_b3=zeros((2, 1, out_pad)),
    )


# --------------------------------------------------------------------------
# ImplicitSAGPT.forward
# --------------------------------------------------------------------------
def implicit_sa_gpt_forward(params, cfg, states, timesteps, actions=None,
                            keys=None, predict_state=False):
    B, T, _ = states.shape
    C = cfg["n_embd"]
    N = B * T
    in_pad = params["enc_w1"].shape[1]

    # --- fused state/key/action encoders (one pallas_call) ---
    s2d = _pad_axis(states.reshape(N, -1).astype(jnp.float32), in_pad)
    if keys is not None:
        k2d = _pad_axis(keys.reshape(N, -1).astype(jnp.float32), in_pad)
    else:
        k2d = jnp.zeros((N, in_pad), jnp.float32)
    if actions is not None:
        a2d = _pad_axis(actions.reshape(N, -1).astype(jnp.float32), in_pad)
    else:
        a2d = jnp.zeros((N, in_pad), jnp.float32)
    enc_in = jnp.stack([s2d, k2d, a2d], axis=0)

    enc_out = fused_encoders(enc_in, params["enc_w1"], params["enc_b1"],
                             params["enc_w2"], params["enc_b2"])[:, :, :C]

    se = enc_out[0].reshape(B, T, C)
    if keys is not None:
        ke = enc_out[1].reshape(B, T, C)
    else:
        ke = jnp.zeros((B, T, C), jnp.float32)
    if actions is not None:
        ae = enc_out[2].reshape(B, T, C)
        # only actions[:, :T-1] are used; final action slot stays zero
        ae = jnp.where(jnp.arange(T)[None, :, None] < T - 1, ae, 0.0)
    else:
        ae = jnp.zeros((B, T, C), jnp.float32)

    # token interleaving via stack+reshape (slot 0=state, 1=key, 2=action)
    tok = jnp.stack([se, ke, ae], axis=2).reshape(B, 3 * T, C)

    # positional embeddings (global gather by timestep + local repeated x3)
    gpe = params["global_pos_emb"][0][timesteps[:, 0].astype(jnp.int32)]   # (B, C)
    lpe = jnp.repeat(params["local_pos_emb"][:, :T, :], 3, axis=1)          # (1, 3T, C)
    x = tok + gpe[:, None, :] + lpe                                         # drop = identity

    # --- fused transformer blocks (one pallas_call) ---
    x_final, x_mid = transformer_blocks(x, params["blocks"], cfg["n_head"],
                                        cfg["state_layer"])

    def slot1(x3):  # rows at interleaved positions 1, 4, 7, ... (key tokens)
        return x3.reshape(B, T, 3, C)[:, :, 1, :].reshape(N, C)

    # --- fused predictors (one pallas_call) ---
    rows_action = slot1(x_final)
    if predict_state:
        rows = jnp.stack([rows_action, slot1(x_mid)], axis=0)   # [action, state]
        n_pred = 2
    else:
        rows = rows_action[None]
        n_pred = 1

    preds = fused_predictors(
        rows,
        params["pred_ln_g"][:n_pred], params["pred_ln_b"][:n_pred],
        params["pred_w1"][:n_pred], params["pred_b1"][:n_pred],
        params["pred_w2"][:n_pred], params["pred_b2"][:n_pred],
        params["pred_w3"][:n_pred], params["pred_b3"][:n_pred])

    ad = params["action_dim"]
    sd = params["state_dim"]
    action_preds = preds[0, :, :ad].reshape(B, T, ad)
    state_preds = preds[1, :, :sd].reshape(B, T, sd) if predict_state else None
    return action_preds, state_preds


if __name__ == "__main__":
    cfg = dict(
        n_embd=32, n_head=4, n_layer=3, block_size=8, max_timestep=16,
        state_layer=1, attn_type="w_key",
        embd_pdrop=0.1, resid_pdrop=0.1, attn_pdrop=0.1,
    )
    state_dim, action_dim, key_dim = 5, 3, 4
    B, T = 2, 4

    root = jax.random.PRNGKey(0)
    kp, ks, ka, kk, kt = jax.random.split(root, 5)
    params = init_params(kp, cfg, state_dim, action_dim, key_dim)

    states = jax.random.normal(ks, (B, T, state_dim), jnp.float32)
    actions = jax.random.normal(ka, (B, T, action_dim), jnp.float32)
    keys_in = jax.random.normal(kk, (B, T, key_dim), jnp.float32)
    timesteps = jax.random.randint(kt, (B, 1), 0, cfg["max_timestep"], jnp.int32)

    action_preds, state_preds = implicit_sa_gpt_forward(
        params, cfg, states, timesteps, actions=actions, keys=keys_in,
        predict_state=True)
    jax.block_until_ready((action_preds, state_preds))

    assert action_preds.shape == (B, T, action_dim)
    assert state_preds.shape == (B, T, state_dim)
    print("KERNEL_OK")
</pallas_src>

<mosaic_0001>
module attributes {stable_mosaic.version = 11 : i64} {
  func.func @_enc_kernel(%arg0: i32, %arg1: i32, %arg2: memref<1x8x128xf32, #tpu.memory_space<vmem>>, %arg3: memref<1x128x256xbf16, #tpu.memory_space<vmem>>, %arg4: memref<1x1x256xf32, #tpu.memory_space<vmem>>, %arg5: memref<1x256x128xbf16, #tpu.memory_space<vmem>>, %arg6: memref<1x1x128xf32, #tpu.memory_space<vmem>>, %arg7: memref<1x8x128xf32, #tpu.memory_space<vmem>>) attributes {dimension_semantics = [#tpu.dimension_semantics<parallel>, #tpu.dimension_semantics<parallel>], iteration_bounds = array<i64: 3, 1>, scalar_prefetch = 0 : i64, scratch_operands = 0 : i64, tpu.core_type = #tpu.core_type<tc>, window_params = [{transform_indices = @transform_0, window_bounds = array<i64: 1, 8, 128>}, {transform_indices = @transform_1, window_bounds = array<i64: 1, 128, 256>}, {transform_indices = @transform_2, window_bounds = array<i64: 1, 1, 256>}, {transform_indices = @transform_3, window_bounds = array<i64: 1, 256, 128>}, {transform_indices = @transform_4, window_bounds = array<i64: 1, 1, 128>}, {transform_indices = @transform_5, window_bounds = array<i64: 1, 8, 128>}]} {
    %c0 = arith.constant 0 : index
    %c0_0 = arith.constant 0 : index
    %c0_1 = arith.constant 0 : index
    %0 = vector.load %arg2[%c0, %c0_0, %c0_1] : memref<1x8x128xf32, #tpu.memory_space<vmem>>, vector<1x8x128xf32>
    %1 = vector.shape_cast %0 : vector<1x8x128xf32> to vector<8x128xf32>
    %2 = arith.truncf %1 : vector<8x128xf32> to vector<8x128xbf16>
    %c0_2 = arith.constant 0 : index
    %c0_3 = arith.constant 0 : index
    %c0_4 = arith.constant 0 : index
    %3 = vector.load %arg3[%c0_2, %c0_3, %c0_4] : memref<1x128x256xbf16, #tpu.memory_space<vmem>>, vector<1x128x256xbf16>
    %4 = vector.shape_cast %3 : vector<1x128x256xbf16> to vector<128x256xbf16>
    %cst = arith.constant dense<0.000000e+00> : vector<8x256xf32>
    %5 = tpu.matmul %2, %4, %cst {dimension_numbers = #tpu.dot_dimension_numbers<[1], [0], [0], [1], [0, 0, 1, 1], [], []>} : vector<8x128xbf16>, vector<128x256xbf16>, vector<8x256xf32> -> vector<8x256xf32>
    %c0_5 = arith.constant 0 : index
    %c0_6 = arith.constant 0 : index
    %c0_7 = arith.constant 0 : index
    %6 = vector.load %arg4[%c0_5, %c0_6, %c0_7] : memref<1x1x256xf32, #tpu.memory_space<vmem>>, vector<1x1x256xf32>
    %7 = vector.shape_cast %6 : vector<1x1x256xf32> to vector<1x256xf32>
    %8 = vector.broadcast %7 : vector<1x256xf32> to vector<8x256xf32>
    %9 = arith.addf %5, %8 : vector<8x256xf32>
    %cst_8 = arith.constant 0.000000e+00 : f32
    %10 = vector.broadcast %cst_8 : f32 to vector<8x256xf32>
    %11 = arith.maximumf %9, %10 : vector<8x256xf32>
    %12 = arith.truncf %11 : vector<8x256xf32> to vector<8x256xbf16>
    %c0_9 = arith.constant 0 : index
    %c0_10 = arith.constant 0 : index
    %c0_11 = arith.constant 0 : index
    %13 = vector.load %arg5[%c0_9, %c0_10, %c0_11] : memref<1x256x128xbf16, #tpu.memory_space<vmem>>, vector<1x256x128xbf16>
    %14 = vector.shape_cast %13 : vector<1x256x128xbf16> to vector<256x128xbf16>
    %cst_12 = arith.constant dense<0.000000e+00> : vector<8x128xf32>
    %15 = tpu.matmul %12, %14, %cst_12 {dimension_numbers = #tpu.dot_dimension_numbers<[1], [0], [0], [1], [0, 0, 1, 1], [], []>} : vector<8x256xbf16>, vector<256x128xbf16>, vector<8x128xf32> -> vector<8x128xf32>
    %c0_13 = arith.constant 0 : index
    %c0_14 = arith.constant 0 : index
    %c0_15 = arith.constant 0 : index
    %16 = vector.load %arg6[%c0_13, %c0_14, %c0_15] : memref<1x1x128xf32, #tpu.memory_space<vmem>>, vector<1x1x128xf32>
    %17 = vector.shape_cast %16 : vector<1x1x128xf32> to vector<1x128xf32>
    %18 = vector.broadcast %17 : vector<1x128xf32> to vector<8x128xf32>
    %19 = arith.addf %15, %18 : vector<8x128xf32>
    %c0_16 = arith.constant 0 : index
    %c0_17 = arith.constant 0 : index
    %c0_18 = arith.constant 0 : index
    %20 = vector.load %arg7[%c0_16, %c0_17, %c0_18] : memref<1x8x128xf32, #tpu.memory_space<vmem>>, vector<1x8x128xf32>
    %21 = vector.shape_cast %20 : vector<1x8x128xf32> to vector<8x128xf32>
    %22 = vector.shape_cast %19 : vector<8x128xf32> to vector<1x8x128xf32>
    tpu.vector_store %arg7[%c0_16, %c0_17, %c0_18], %22 {strides = array<i32>} : memref<1x8x128xf32, #tpu.memory_space<vmem>>, vector<1x8x128xf32>,
    return
  }
  func.func @transform_0(%arg0: i32, %arg1: i32) -> (i32, i32, i32) {
    %c0_i32 = arith.constant 0 : i32
    %c0_i32_0 = arith.constant 0 : i32
    return %arg0, %arg1, %c0_i32 : i32, i32, i32
  }
  func.func @transform_1(%arg0: i32, %arg1: i32) -> (i32, i32, i32) {
    %c0_i32 = arith.constant 0 : i32
    %c0_i32_0 = arith.constant 0 : i32
    %c0_i32_1 = arith.constant 0 : i32
    return %arg0, %c0_i32, %c0_i32_0 : i32, i32, i32
  }
  func.func @transform_2(%arg0: i32, %arg1: i32) -> (i32, i32, i32) {
    %c0_i32 = arith.constant 0 : i32
    %c0_i32_0 = arith.constant 0 : i32
    %c0_i32_1 = arith.constant 0 : i32
    return %arg0, %c0_i32, %c0_i32_0 : i32, i32, i32
  }
  func.func @transform_3(%arg0: i32, %arg1: i32) -> (i32, i32, i32) {
    %c0_i32 = arith.constant 0 : i32
    %c0_i32_0 = arith.constant 0 : i32
    %c0_i32_1 = arith.constant 0 : i32
    return %arg0, %c0_i32, %c0_i32_0 : i32, i32, i32
  }
  func.func @transform_4(%arg0: i32, %arg1: i32) -> (i32, i32, i32) {
    %c0_i32 = arith.constant 0 : i32
    %c0_i32_0 = arith.constant 0 : i32
    %c0_i32_1 = arith.constant 0 : i32
    return %arg0, %c0_i32, %c0_i32_0 : i32, i32, i32
  }
  func.func @transform_5(%arg0: i32, %arg1: i32) -> (i32, i32, i32) {
    %c0_i32 = arith.constant 0 : i32
    %c0_i32_0 = arith.constant 0 : i32
    return %arg0, %arg1, %c0_i32 : i32, i32, i32
  }
}

</mosaic_0001>

<bundles_post_ra>
// kernel: tpu_custom_call.1
= control target key start
LH: loop header
LB: loop body
LE: loop exit
PB: predicated region body
PF: predicated region fallthrough
CT: control target
= control target key end

     0   :  { %s1573_s0 = inlined_call_operand.hbm [shape: f32[3,8,128], index: 0, kind: input, shape index: {}]   ;;  %s1574_s1 = inlined_call_operand.hbm [shape: bf16[3,128,256], index: 1, kind: input, shape index: {}]   ;;  %s1575_s2 = inlined_call_operand.vmem [shape: f32[3,1,256], index: 2, kind: input, shape index: {}]   ;;  %s1576_s3 = inlined_call_operand.hbm [shape: bf16[3,256,128], index: 3, kind: input, shape index: {}]   ;;  %s1577_s4 = inlined_call_operand.vmem [shape: f32[3,1,128], index: 4, kind: input, shape index: {}]   ;;  %s1578_s5 = inlined_call_operand.hbm [shape: f32[3,8,128], index: 5, kind: output, shape index: {}]  }
   0x1   :  { %1589 = sst [smem:[#allocation17_spill]] %s1574_s1 }
   0x2   :  { %10 = vsyncpa [#allocation3], 0 }
   0x3   :  { %12 = vsyncpa [#allocation3 + $0x1], 0 }
   0x4   :  { %13 = vsyncpa [#allocation6], 0 }
   0x5   :  { %15 = vsyncpa [#allocation6 + $0x1], 0 }
   0x6   :  { %16 = vsyncpa [#allocation4], 0 }
   0x7   :  { %18 = vsyncpa [#allocation4 + $0x1], 0  ;;  %s1269_s18 = smov 0   ;;  %s1271_s19 = smov 0  }
   0x8   :  { %s1273_s20 = smov 0   ;;  %s1275_s21 = smov 0  }
   0x9   :  { %s1277_s22 = smov 0   ;;  %s1279_s23 = smov 0  }
   0xa LB: > { %1590 = sst [smem:[#allocation12_spill]] %s1216_s20  ;;  %s1300_s24 = sadd.s32 4294967295, %s1228_s23   ;;  %s1228_s23 = sphi %s1279_s23, %s24_s23   ;;  %s1224_s22 = sphi %s1277_s22, %s1614_s22   ;;  %s1220_s21 = sphi %s1275_s21, %s1613_s21   ;;  %s1216_s20 = sphi %s1273_s20, %s1612_s20   ;;  %s1212_s19 = sphi %s1271_s19, %s1616_s19   ;;  %s1208_s18 = sphi %s1269_s18, %s1615_s18  }
   0xb   : > { %1591 = sst [smem:[#allocation13_spill]] %s1224_s22  ;;  %s857_s25 = sadd.s32 4294967294, %s1228_s23  }
   0xc   : > { %s36_s26 = sadd.s32 1, %s1224_s22  ;;  %s45_s27 = sadd.s32 1, %s1216_s20 }
   0xd   : > { %p38_p0 = scmp.ge.s32.totalorder %s36_s26, 3  ;;  %p52_p1 = scmp.ne.s32.totalorder %s1216_s20, %s1212_s19 }
   0xe   : > { %p53_p2 = scmp.eq.s32.totalorder %s1228_s23, 0  ;;  %p58_p3 = scmp.ne.s32.totalorder %s1212_s19, %s1208_s18 }
   0xf   : > { %s1618_s26 = smov (%p38_p0, %s36_s26), 0  ;;  %p59_p5 = scmp.eq.s32.totalorder %s1300_s24, 0 }
  0x10   : > { %1592 = sst [smem:[#allocation14_spill]] %s1618_s26  ;;  %p1312_p4 = por %p53_p2, %p52_p1 }
  0x11   : > { %s40_s29 = ssub.s32 %s1224_s22, %s1618_s26  ;;  %p188_p6 = scmp.eq.s32.totalorder %s1300_s24, 2 }
  0x12   : > { %p43_p7 = scmp.eq.s32.totalorder %s40_s29, 0  ;;  %p1320_p8 = por %p59_p5, %p58_p3 }
  0x13   : > { %p1324_p9 = por %p188_p6, %p52_p1  ;;  %p194_p10 = scmp.eq.s32.totalorder %s857_s25, 2 }
  0x14   : > { %s1594_s30 = scalar_select %p1320_p8, 1, 0 }
  0x15   : > { %s1595_s6 = scalar_select %p1324_p9, 1, 0 }
  0x16   : > { %s1329_s7 = scalar_select %p43_p7, %s1216_s20, %s45_s27  }
  0x17   : > { %p1331_p11 = por %p194_p10, %p58_p3  ;;  %p957_p12 = scmp.lt.s32.totalorder %s1228_s23, 3 }
  0x18   : > { %1596 = sst [smem:[#allocation15_spill]] %s1329_s7  ;;  %s1337_s9 = sand.u32 1, %s1216_s20  }
  0x19   : > { %s1597_s8 = scalar_select %p1331_p11, 1, 0 }
  0x1a   : > { %s233_s10 = sand.u32 1, %s1228_s23   ;;  %s1579_s11 = sshll.u32 %s1337_s9, 7 }
  0x1b   : > { %1598 = sst [smem:[#allocation16_spill]] %s1597_s8  ;;  %p1343_p13 = pnand %p957_p12, %p1312_p4 }
  0x1c   : > { %s1580_s13 = sshll.u32 %s1224_s22, 11  ;;  %s1600_s1 = sld [smem:[#allocation17_spill]] }
  0x1d   : > { %s1599_s12 = scalar_select %p1343_p13, 1, 0 }
  0x1e   : > { %s237_s17 = scalar_lea.vmem [#allocation5], %s1579_s11  ;;  %s1359_s27 = scalar_lea.sflag [#allocation6], %s233_s10 }
  0x1f   : > { %s244_s25 = sshll.u32 %s237_s17, 4  ;;  %p1365_p1 = pneg %p1343_p13  ;;  %s1357_s25 = int_to_ptr.vmem [resolvable:$true] %s244_s25 }
  0x22   : > { %s1353_s16 = scalar_lea.hbm %s1600_s1, %s1580_s13  ;;  %s1057_s11 = scalar_lea.hbm %s1600_s1, 6144 }
  0x23   : > { %s1052_s28 = scalar_lea.hbm %s1353_s16, 2048  ;;  %p1058_p4 = scmp.lt.u32.totalorder %s1353_s16, %s1600_s1 }
  0x24   : > { %p1053_p0 = scmp.ne.s32.totalorder %s1353_s16, %s1052_s28  ;;  %p1059_p5 = scmp.lt.u32.totalorder %s1057_s11, %s1052_s28 }
  0x25   : > { %p1061_p7 = scmp.lt.u32.totalorder %s1052_s28, %s1353_s16 }
  0x26   : > { %p1055_p2 = pnand %p1365_p1, %p1053_p0  ;;  %p1060_p6 = por %p1059_p5, %p1058_p4 }
  0x28   : > { %p1056_p3 = pneg %p1055_p2  ;;  %p1062_p10 = por %p1061_p7, %p1060_p6 }
  0x2a   : > { %p1063_p12 = pnand %p1062_p10, %p1056_p3 }
  0x2c   : > { %1066 = shalt.err (!%p1063_p12)
}
  0x2d   : > { %s1067_s10 = scalar_lea.vmem %s1357_s25, 2048  ;;  %s1230_s14 = smov [#allocation5]  }
  0x2e   : > { %p1068_p0 = scmp.ne.s32.totalorder %s1357_s25, %s1067_s10  ;;  %s1072_s15 = sshll.u32 %s1230_s14, 4  ;;  %s1073_s15 = int_to_ptr.vmem [resolvable:$false] %s1072_s15 }
  0x2f   : > { %s1074_s13 = scalar_lea.vmem %s1073_s15, 4096  ;;  %p1075_p9 = scmp.lt.s32.totalorder %s1357_s25, %s1073_s15 }
  0x30   : > { %p1070_p2 = pnand %p1068_p0, %p1365_p1  ;;  %p1076_p8 = scmp.lt.s32.totalorder %s1074_s13, %s1067_s10 }
  0x32   : > { %p1071_p11 = pneg %p1070_p2  ;;  %p1077_p4 = por %p1076_p8, %p1075_p9 }
  0x34   : > { %p1078_p5 = pnand %p1077_p4, %p1071_p11 }
  0x36   : > { %1081 = shalt.err (!%p1078_p5)
}
  0x37   : > { %s1231_s11 = smov 128   ;;  %s1232_s28 = smov 8  }
  0x38   : > { %949 = dma.hbm_to_vmem [thread:$0]  (!%p1343_p13), %s1353_s16, 2048, %s1357_s25, %s1359_s27, %s1231_s11, %s1231_s11, %s1232_s28  }
  0x39   : > { %s1602_s17 = sshll.u32 %s1224_s22, 11  ;;  %s1603_s13 = sshll.u32 %s1337_s9, 7 }
  0x3a   : > { %s1394_s15 = scalar_lea.hbm %s1576_s3, %s1602_s17  ;;  %s265_s1 = scalar_lea.vmem [#allocation7], %s1603_s13 }
  0x3b   : > { %s272_s26 = sshll.u32 %s265_s1, 4  ;;  %p868_p8 = scmp.ge.s32.totalorder %s1228_s23, 1  ;;  %s1399_s26 = int_to_ptr.vmem [resolvable:$true] %s272_s26 }
  0x3c   : > { %p286_p9 = scmp.lt.s32.totalorder %s1228_s23, 4  ;;  %s860_s20 = sshll.u32 %s1337_s9, 3 }
  0x3d   : > { %s861_s16 = sshll.u32 %s1224_s22, 7  ;;  %s218_s1 = scalar_lea.vmem [#allocation2], %s860_s20 }
  0x3e   : > { %p1402_p11 = pnand %p868_p8, %p286_p9  ;;  %s1411_s28 = scalar_lea.hbm %s1573_s0, %s861_s16 }
  0x3f   : > { %s226_s17 = sshll.u32 %s218_s1, 4  ;;  %s215_s10 = scalar_lea.sflag [#allocation3], %s1337_s9  ;;  %s227_s17 = int_to_ptr.vmem [resolvable:$true] %s226_s17 }
  0x40   : > { %s1604_s7 = scalar_select %p1402_p11, 1, 0 }
  0x41   : > { %s1082_s14 = scalar_lea.hbm %s1411_s28, 128  ;;  %s1087_s8 = scalar_lea.hbm %s1573_s0, 384 }
  0x42   : > { %p1083_p3 = scmp.ne.s32.totalorder %s1411_s28, %s1082_s14  ;;  %p1088_p10 = scmp.lt.u32.totalorder %s1411_s28, %s1573_s0 }
  0x43   : > { %p1089_p12 = scmp.lt.u32.totalorder %s1087_s8, %s1082_s14  ;;  %p1091_p2 = scmp.lt.u32.totalorder %s1082_s14, %s1411_s28 }
  0x44   : > { %p1085_p6 = pnand %p1083_p3, %p1365_p1 }
  0x45   : > { %p1090_p0 = por %p1089_p12, %p1088_p10 }
  0x46   : > { %p1086_p7 = pneg %p1085_p6 }
  0x47   : > { %p1092_p4 = por %p1091_p2, %p1090_p0 }
  0x49   : > { %p1093_p5 = pnand %p1092_p4, %p1086_p7 }
  0x4b   : > { %1096 = shalt.err (!%p1093_p5)
}
  0x4c   : > { %s1097_s20 = scalar_lea.vmem %s227_s17, 128  ;;  %s1233_s9 = smov [#allocation2]  }
  0x4d   : > { %p1098_p8 = scmp.ne.s32.totalorder %s227_s17, %s1097_s20  ;;  %s1102_s11 = sshll.u32 %s1233_s9, 4  ;;  %s1103_s11 = int_to_ptr.vmem [resolvable:$false] %s1102_s11 }
  0x4e   : > { %s1104_s22 = scalar_lea.vmem %s1103_s11, 256  ;;  %p1105_p6 = scmp.lt.s32.totalorder %s227_s17, %s1103_s11 }
  0x4f   : > { %p1100_p9 = pnand %p1098_p8, %p1365_p1  ;;  %p1106_p11 = scmp.lt.s32.totalorder %s1104_s22, %s1097_s20 }
  0x51   : > { %p1101_p3 = pneg %p1100_p9  ;;  %p1107_p13 = por %p1106_p11, %p1105_p6 }
  0x53   : > { %p1108_p10 = pnand %p1107_p13, %p1101_p3 }
  0x55   : > { %1111 = shalt.err (!%p1108_p10)
}
  0x56   : > { %p1605_p12 = scmp.ne.s32.totalorder %s1599_s12, 0  ;;  %s1112_s8 = scalar_lea.hbm %s1394_s15, 2048 }
  0x57   : > { %p1113_p7 = scmp.ne.s32.totalorder %s1394_s15, %s1112_s8  ;;  %s1117_s13 = scalar_lea.hbm %s1576_s3, 6144 }
  0x58   : > { %946 = dma.hbm_to_vmem [thread:$0]  (!%p1605_p12), %s1411_s28, 128, %s227_s17, %s215_s10  }
  0x59   : > { %p1115_p0 = pnand %p1113_p7, %p1365_p1  ;;  %p1118_p13 = scmp.lt.u32.totalorder %s1394_s15, %s1576_s3 }
  0x5a   : > { %p1119_p11 = scmp.lt.u32.totalorder %s1117_s13, %s1112_s8  ;;  %p1121_p5 = scmp.lt.u32.totalorder %s1112_s8, %s1394_s15 }
  0x5b   : > { %p1116_p2 = pneg %p1115_p0 }
  0x5c   : > { %p1120_p4 = por %p1119_p11, %p1118_p13 }
  0x5e   : > { %p1122_p8 = por %p1121_p5, %p1120_p4 }
  0x60   : > { %p1123_p9 = pnand %p1122_p8, %p1116_p2 }
  0x62   : > { %1126 = shalt.err (!%p1123_p9)
}
  0x63   : > { %s1127_s28 = scalar_lea.vmem %s1399_s26, 2048  ;;  %s1234_s17 = smov [#allocation7]  }
  0x64   : > { %p1128_p3 = scmp.ne.s32.totalorder %s1399_s26, %s1127_s28  ;;  %s1132_s10 = sshll.u32 %s1234_s17, 4  ;;  %s1133_s10 = int_to_ptr.vmem [resolvable:$false] %s1132_s10 }
  0x65   : > { %s1134_s20 = scalar_lea.vmem %s1133_s10, 4096  ;;  %p1135_p7 = scmp.lt.s32.totalorder %s1399_s26, %s1133_s10 }
  0x66   : > { %p1130_p6 = pnand %p1128_p3, %p1365_p1  ;;  %p1136_p0 = scmp.lt.s32.totalorder %s1134_s20, %s1127_s28 }
  0x68   : > { %p1131_p10 = pneg %p1130_p6  ;;  %p1137_p13 = por %p1136_p0, %p1135_p7 }
  0x6a   : > { %p1138_p11 = pnand %p1137_p13, %p1131_p10 }
  0x6c   : > { %1141 = shalt.err (!%p1138_p11)
}
  0x6d   : > { %s1235_s9 = smov 64   ;;  %s1236_s11 = smov 4  }
  0x6e   : > { %952 = dma.hbm_to_vmem [thread:$0]  (!%p1605_p12), %s1394_s15, 2048, %s1399_s26, %s1359_s27, %s1235_s9, %s1235_s9, %s1236_s11  }
  0x6f   : > { %p1606_p1 = scmp.ne.s32.totalorder %s1604_s7, 0 }
  0x70   : > { %s1456_s29 = sand.u32 (!%p1606_p1), 1, %s1212_s19   ;;  %p1607_p2 = scmp.ne.s32.totalorder (!%p1606_p1), %s1594_s30, 0 }
  0x71   : > { %290 = sbr.rel (%p1606_p1) target bundleno = 608 (0x260), region = 40  ;;  %s869_s22 = sshll.u32 (!%p1606_p1), %s1456_s29, 3 }
  0x72   : > { %s293_s8 = scalar_lea.sflag (!%p1606_p1), [#allocation3], %s1456_s29  ;;  %s1462_s1 = scalar_lea.vmem (!%p1606_p1), [#allocation2], %s869_s22 }
  0x78   : > { %1195 = dma.done.wait (%p1607_p2), %s293_s8, 128  }
  0x79   : > { %1197 = vsyncadd (%p1607_p2), %s293_s8, 4294967168  ;;  %s301_s26 = sand.u32 1, %s1300_s24   ;;  %s870_s7 = sshll.u32 %s1456_s29, 7 }
  0x7a   : > { %s302_s12 = scalar_lea.sflag [#allocation6], %s301_s26  ;;  %s1470_s27 = scalar_lea.vmem [#allocation5], %s870_s7 }
  0x7b   : > { %1199 = dma.done.wait (%p1607_p2), %s302_s12, 4096  }
  0x7c   : > { %1201 = vsyncadd (%p1607_p2), %s302_s12, 4294963200  ;;  %v1237_v0 = vmov 0   ;;  %v1012_v1 = vld [vmem:[%s1470_s27 + $0x4] ss:$8 sps:$4 sm:$0xff]   ;;  %v1014_v2 = vld [vmem:[%s1470_s27] ss:$8 sps:$4 sm:$0xff]   ;;  %v386_v35 = vlaneseq }
  0x7d   : > { %508 = vmatprep.mubr.bf16.mxu0 %v1237_v0  ;;  %476 = vmatprep.subr.bf16.mxu0 %v1012_v1  ;;  %v1015_v3 = vld [vmem:[%s1470_s27 + $0x14] ss:$8 sps:$4 sm:$0xff]   ;;  %v1017_v4 = vld [vmem:[%s1470_s27 + $0x10] ss:$8 sps:$4 sm:$0xff]   ;;  %v1018_v5 = vld [vmem:[%s1470_s27 + $0x24] ss:$8 sps:$4 sm:$0xff]  }
  0x7e   : > { %477 = vmatpush1.bf16.msra.mxu0 %v1014_v2  ;;  %v1020_v6 = vld [vmem:[%s1470_s27 + $0x20] ss:$8 sps:$4 sm:$0xff]   ;;  %v1021_v7 = vld [vmem:[%s1470_s27 + $0x34] ss:$8 sps:$4 sm:$0xff]   ;;  %v1023_v8 = vld [vmem:[%s1470_s27 + $0x30] ss:$8 sps:$4 sm:$0xff]  }
  0x7f   : > { %478 = vmatprep.subr.bf16.mxu0 %v1015_v3  ;;  %v1024_v9 = vld [vmem:[%s1470_s27 + $0x44] ss:$8 sps:$4 sm:$0xff]   ;;  %s1485_s24 = scalar_lea.vmem [#allocation7], %s870_s7  ;;  %v1026_v12 = vld [vmem:[%s1470_s27 + $0x40] ss:$8 sps:$4 sm:$0xff]   ;;  %v366_v27 = vld [vmem:[%s1462_s1] sm:$0xff] }
  0x80   : > { %v1036_v10 = vld [vmem:[%s1485_s24 + $0x40] sm:$0xff]   ;;  %v1038_v13 = vld [vmem:[%s1485_s24 + $0x48] sm:$0xff]   ;;  %v1040_v15 = vld [vmem:[%s1485_s24 + $0x50] sm:$0xff]   ;;  %v367_v29 = vpack.c.bf16 %v366_v27, %v366_v27  ;;  %p358_p12 = scmp.lt.s32.totalorder %s1220_s21, 2  ;;  %v387_v36 = vshrl.u32 %v386_v35, 7  ;;  %s908_s10 = sshll.u32 %s1220_s21, 7 }
  0x81   : > { %v1037_v11 = vld [vmem:[%s1485_s24] sm:$0xff]   ;;  %913 = vmatprep.subr.bf16.mxu1 %v1036_v10  ;;  %v1039_v14 = vld [vmem:[%s1485_s24 + $0x8] sm:$0xff]   ;;  %v1027_v16 = vld [vmem:[%s1470_s27 + $0x54] ss:$8 sps:$4 sm:$0xff]   ;;  %s357_s20 = scalar_lea.vmem [#allocation8], %s869_s22  ;;  %s1525_s1 = scalar_lea.hbm %s1578_s5, %s908_s10 }
  0x82   : > { %479 = vmatpush1.bf16.msra.mxu0 %v1017_v4  ;;  %914 = vmatpush3.bf16.msra.mxu1 %v1037_v11  ;;  %v1029_v17 = vld [vmem:[%s1470_s27 + $0x50] ss:$8 sps:$4 sm:$0xff]   ;;  %v1030_v20 = vld [vmem:[%s1470_s27 + $0x64] ss:$8 sps:$4 sm:$0xff]   ;;  %v1032_v21 = vld [vmem:[%s1470_s27 + $0x60] ss:$8 sps:$4 sm:$0xff]  }
  0x83   : > { %480 = vmatprep.subr.bf16.mxu0 %v1018_v5  ;;  %915 = vmatprep.subr.bf16.mxu1 %v1038_v13  ;;  %v1041_v18 = vld [vmem:[%s1485_s24 + $0x10] sm:$0xff]   ;;  %v1042_v19 = vld [vmem:[%s1485_s24 + $0x58] sm:$0xff]   ;;  %v1044_v24 = vld [vmem:[%s1485_s24 + $0x60] sm:$0xff]   ;;  %s359_s30 = scalar_select %p358_p12, %s1220_s21, 2  ;;  %v388_v37 = vsub.s32 0, %v387_v36  ;;  %v392_v39 = vsub.s32 1, %v387_v36 }
  0x84   : > { %v1033_v22 = vld [vmem:[%s1470_s27 + $0x74] ss:$8 sps:$4 sm:$0xff]   ;;  %v1045_v25 = vld [vmem:[%s1485_s24 + $0x20] sm:$0xff]   ;;  %v1035_v26 = vld [vmem:[%s1470_s27 + $0x70] ss:$8 sps:$4 sm:$0xff]   ;;  %s712_s9 = sshll.u32 %s357_s20, 4  ;;  %s1527_s9 = int_to_ptr.vmem [resolvable:$true] %s712_s9 }
  0x85   : > { %v1043_v23 = vld [vmem:[%s1485_s24 + $0x18] sm:$0xff]   ;;  %v1046_v28 = vld [vmem:[%s1485_s24 + $0x68] sm:$0xff]   ;;  %v1048_v31 = vld [vmem:[%s1485_s24 + $0x70] sm:$0xff]   ;;  %s873_s15 = sshll.u32 %s359_s30, 1  ;;  %s364_s17 = scalar_lea.vmem %s1577_s4, %s359_s30 }
  0x86   : > { %481 = vmatpush1.bf16.msra.mxu0 %v1020_v6  ;;  %916 = vmatpush3.bf16.msra.mxu1 %v1039_v14  ;;  %v1047_v30 = vld [vmem:[%s1485_s24 + $0x28] sm:$0xff]   ;;  %v1049_v32 = vld [vmem:[%s1485_s24 + $0x30] sm:$0xff]   ;;  %v1050_v33 = vld [vmem:[%s1485_s24 + $0x78] sm:$0xff]   ;;  %s361_s25 = scalar_lea.vmem %s1575_s2, %s873_s15  ;;  %s698_s26 = scalar_lea.sflag [#allocation4], %s1456_s29 }
  0x87   : > { %482 = vmatprep.subr.bf16.mxu0 %v1021_v7  ;;  %917 = vmatprep.subr.bf16.mxu1 %v1040_v15  ;;  %v1051_v34 = vld [vmem:[%s1485_s24 + $0x38] sm:$0xff]   ;;  %v384_v38 = vld [vmem:[%s361_s25] sm:$0x3]  ;;  %s1142_s21 = scalar_lea.vmem %s1527_s9, 128  ;;  %p1608_p5 = scmp.ne.s32.totalorder %s1595_s6, 0 }
  0x88   : > { %v389_v40 = vrot.slane %v384_v38, %v388_v37  ;;  %v393_v41 = vrot.slane %v384_v38, %v392_v39  ;;  %v890_v53 = vld [vmem:[%s364_s17] ss:$0 sm:$0xff]  ;;  %p1143_p4 = scmp.ne.s32.totalorder %s1527_s9, %s1142_s21  ;;  %s1238_s22 = smov [#allocation8]  }
  0x89   : > { %s1146_s7 = sshll.u32 %s1238_s22, 4  ;;  %s1147_s7 = int_to_ptr.vmem [resolvable:$false] %s1146_s7 }
  0x8a   : > { %483 = vmatpush1.bf16.msra.mxu0 %v1023_v8  ;;  %918 = vmatpush3.bf16.msra.mxu1 %v1041_v18  ;;  %p1144_p8 = pnand %p1143_p4, %p1608_p5  ;;  %s1148_s12 = scalar_lea.vmem %s1147_s7, 256 }
  0x8b   : > { %484 = vmatprep.subr.bf16.mxu0 %v1024_v9  ;;  %919 = vmatprep.subr.bf16.mxu1 %v1042_v19  ;;  %p1149_p3 = scmp.lt.s32.totalorder %s1527_s9, %s1147_s7  ;;  %p1150_p6 = scmp.lt.s32.totalorder %s1148_s12, %s1142_s21 }
  0x8c   : > { %p1145_p9 = pneg %p1144_p8 }
  0x8d   : > { %p1151_p10 = por %p1150_p6, %p1149_p3 }
  0x8e   : > { %485 = vmatpush1.bf16.msra.mxu0 %v1026_v12  ;;  %920 = vmatpush3.bf16.msra.mxu1 %v1043_v23 }
  0x8f   : > { %486 = vmatprep.subr.bf16.mxu0 %v1027_v16  ;;  %921 = vmatprep.subr.bf16.mxu1 %v1044_v24  ;;  %p1152_p7 = pnand %p1151_p10, %p1145_p9 }
  0x92   : > { %487 = vmatpush1.bf16.msra.mxu0 %v1029_v17  ;;  %922 = vmatpush3.bf16.msra.mxu1 %v1045_v25 }
  0x93   : > { %488 = vmatprep.subr.bf16.mxu0 %v1030_v20  ;;  %923 = vmatprep.subr.bf16.mxu1 %v1046_v28 }
  0x96   : > { %489 = vmatpush1.bf16.msra.mxu0 %v1032_v21  ;;  %924 = vmatpush3.bf16.msra.mxu1 %v1047_v30 }
  0x97   : > { %490 = vmatprep.subr.bf16.mxu0 %v1033_v22  ;;  %925 = vmatprep.subr.bf16.mxu1 %v1048_v31 }
  0x9a   : > { %491 = vmatpush1.bf16.msra.mxu0 %v1035_v26  ;;  %926 = vmatpush3.bf16.msra.mxu1 %v1049_v32 }
  0x9b   : > { %927 = vmatprep.subr.bf16.mxu1 %v1050_v33 }
  0x9d   : > { %509 = vmatmul.mubr.bf16.vlgmr.msra.gmra.mrb[0].mxu0 %v367_v29 }
  0x9e   : > { %928 = vmatpush3.bf16.msra.mxu1 %v1051_v34 }
 0x170   : > { %v510_v42 = vpop.f32.mrb[0].mxu0 }
 0x171   : > { %v511_v43 = vadd.f32 %v510_v42, %v389_v40  ;;  %v512_v44 = vpop.f32.mrb[1].mxu0 }
 0x172   : > { %v513_v45 = vadd.f32 %v512_v44, %v393_v41  ;;  %v514_v46 = vpop.f32.mrb[2].mxu0 }
 0x173   : > { %v517_v47 = vmax.f32 %v511_v43, 0.0  ;;  %v515_v48 = vpop.f32.mrb[3].mxu0 }
 0x174   : > { %v518_v49 = vmax.f32 %v513_v45, 0.0 }
 0x175   : > { %v519_v51 = vpack.c.bf16 %v517_v47, %v517_v47 }
 0x176   : > { %v520_v50 = vpack.c.bf16 %v518_v49, %v518_v49 }
 0x178   : > { %688 = vmatprep.mubr.bf16.mxu1 %v520_v50 }
 0x179   : > { %689 = vmatmul.mubr.bf16.vlgmr.msra.gmra.mrb[0].mxu1 %v519_v51 }
 0x24c   : > { %v929_v52 = vpop.f32.mrb[0].mxu1 }
 0x24d   : > { %v930_v54 = vpop.f32.mrb[1].mxu1 }
 0x24e   : > { %v931_v55 = vadd.f32 %v930_v54, %v929_v52  ;;  %v932_v56 = vpop.f32.mrb[2].mxu1 }
 0x24f   : > { %v933_v57 = vpop.f32.mrb[3].mxu1 }
 0x250   : > { %v691_v58 = vadd.f32 %v931_v55, %v890_v53 }
 0x252   : > { %696 = vst [vmem:[%s357_s20] sm:$0xff] %v691_v58 }
 0x253   : > { %1155 = shalt.err (!%p1152_p7)
}
 0x254   : > { %s1156_s29 = scalar_lea.hbm %s1525_s1, 128  ;;  %s1160_s30 = scalar_lea.hbm %s1578_s5, 384 }
 0x255   : > { %p1157_p0 = scmp.ne.s32.totalorder %s1525_s1, %s1156_s29  ;;  %p1161_p1 = scmp.lt.u32.totalorder %s1525_s1, %s1578_s5 }
 0x256   : > { %p1162_p2 = scmp.lt.u32.totalorder %s1160_s30, %s1156_s29  ;;  %p1164_p4 = scmp.lt.u32.totalorder %s1156_s29, %s1525_s1 }
 0x257   : > { %p1158_p13 = pnand %p1157_p0, %p1608_p5 }
 0x258   : > { %p1163_p12 = por %p1162_p2, %p1161_p1 }
 0x259   : > { %p1159_p11 = pneg %p1158_p13 }
 0x25a   : > { %p1165_p8 = por %p1164_p4, %p1163_p12 }
 0x25c   : > { %p1166_p9 = pnand %p1165_p8, %p1159_p11 }
 0x25e   : > { %1169 = shalt.err (!%p1166_p9)
}
 0x25f   : > { %941 = dma.vmem_to_hbm [thread:$0]  (%p1608_p5), %s1527_s9, 128, %s1525_s1, %s698_s26  }
 0x260 PF: > { %s1609_s13 = sld [smem:[#allocation16_spill]]  ;;  %p958_p3 = scmp.ge.s32.totalorder %s1228_s23, 2 }
 0x261   : > { %s724_s25 = sand.u32 1, %s1208_s18  }
 0x262   : > { %s725_s16 = scalar_lea.sflag [#allocation4], %s724_s25 }
 0x266   : > { %p1610_p6 = scmp.ne.s32.totalorder %s1609_s13, 0 }
 0x268   : > { %p954_p10 = pnand %p958_p3, %p1610_p6 }
 0x26a   : > { %1203 = dma.done.wait (!%p954_p10), %s725_s16, 128  }
 0x26b   : > { %1205 = vsyncadd (!%p954_p10), %s725_s16, 4294967168  ;;  %s24_s23 = sadd.s32 1, %s1228_s23   ;;  %s1611_s28 = sld [smem:[#allocation12_spill]] }
 0x26c   : > { %p21_p7 = scmp.ge.s32.totalorder %s24_s23, 5   ;;  %s1612_s20 = sld [smem:[#allocation15_spill]] }
 0x26d   : > { %s1613_s21 = sld [smem:[#allocation13_spill]]  ;;  %s1614_s22 = sld [smem:[#allocation14_spill]] }
 0x26e   : > { %s1615_s18 = smov %s1212_s19  ;;  %23 = sbr.rel (!%p21_p7) target bundleno = 10 (0xa), region = 115 }
 0x271   : > { %s1616_s19 = smov %s1611_s28 }
 0x275   :  { %730 = vsyncpa [#allocation3], 1 }
 0x276   :  { %732 = vsyncpa [#allocation3 + $0x1], 1 }
 0x277   :  { %733 = vsyncpa [#allocation6], 1 }
 0x278   :  { %735 = vsyncpa [#allocation6 + $0x1], 1 }
 0x279   :  { %736 = vsyncpa [#allocation4], 1 }
 0x27a   :  { %738 = vsyncpa [#allocation4 + $0x1], 1 }

</bundles_post_ra>
